<compile_context>
chip_gen: v7x
topology: tpu7x:2x2x1
jax: 0.10.0
libtpu: 0.0.40
codegen_flags: <defaults>
</compile_context>

<pallas_src>
import functools

import jax
import jax.numpy as jnp
from jax.experimental import pallas as pl
from jax.experimental.pallas import tpu as pltpu

_IGNORE_INDEX = -100


def _ce_kernel(logits_ref, tgt_ref, sum_ref, cnt_ref, *, n_rows, inner, tm):
    s = pl.program_id(0)
    k = pl.program_id(1)

    @pl.when(k == 0)
    def _():
        sum_ref[...] = jnp.zeros_like(sum_ref)
        cnt_ref[...] = jnp.zeros_like(cnt_ref)

    logits = logits_ref[...].astype(jnp.float32)            # (TM, C) f32
    tgt = tgt_ref[...]                                       # (TM, 1) int32

    # Global row id per sublane row. Uses the *un-clamped* block index so rows
    # belonging to partial / redundant edge blocks always fail the bound check
    # and contribute exactly zero (their data may be garbage).
    rows = (s * inner + k) * tm + jax.lax.broadcasted_iota(jnp.int32, (tm, 1), 0)
    valid = (tgt != _IGNORE_INDEX) & (rows < n_rows)         # (TM, 1) bool

    # Numerically stable cross-entropy; `shifted` reused for the target gather.
    m = jnp.max(logits, axis=-1, keepdims=True)              # (TM, 1)
    shifted = logits - m                                     # (TM, C)
    sumexp = jnp.sum(jnp.exp(shifted), axis=-1, keepdims=True)
    col = jax.lax.broadcasted_iota(jnp.int32, shifted.shape, 1)
    picked = jnp.sum(jnp.where(col == tgt, shifted, 0.0), axis=-1, keepdims=True)
    # lse - logits[tgt] == log(sumexp) - shifted[tgt]; NaN/Inf from masked rows
    # sits only in the unselected branch of the select and is discarded.
    row_loss = jnp.where(valid, jnp.log(sumexp) - picked, 0.0)

    # accumulate this superblock's partials into its resident output tiles
    sum_ref[...] += jnp.sum(row_loss)
    cnt_ref[...] += jnp.sum(valid.astype(jnp.int32))


def _round_up(x, m):
    return ((x + m - 1) // m) * m


def _tpu_vmem_bytes():
    try:
        return int(pltpu.get_tpu_info().vmem_capacity_bytes)
    except Exception:
        return 64 * 1024 * 1024  # conservative (v7x-sized) fallback


def _is_single_tensorcore():
    try:
        kind = jax.devices()[0].device_kind.lower()
    except Exception:
        return False
    return any(t in kind for t in ("v5e", "v5 lite", "v6e", "v6 lite"))


def cross_entropy(pred, target):
    """Equivalent of CrossEntropy.forward(pred, target).

    pred:   float array (..., C)   (f32 or bf16; streamed as-is, upcast in-kernel)
    target: int array, shape == pred.shape[:-1]
    returns scalar mean cross-entropy (float32), reduction='mean', ignore_index=-100.
    """
    C = pred.shape[-1]
    logits = pred.reshape(-1, C)
    tgt2 = target.reshape(-1, 1).astype(jnp.int32)
    N = logits.shape[0]

    # --- generation-aware tile sizing ---
    vmem_phys = _tpu_vmem_bytes()
    # <= ~48 MiB scoped on v7x (64 MiB physical), ~96 MiB on v5e/v6e (128 MiB).
    vmem_limit = min((vmem_phys * 3) // 4, 100 * 1024 * 1024)
    budget = (vmem_limit * 7) // 10  # headroom for accumulators / compiler scratch

    c_vmem = _round_up(C, 128)  # lane-padded on-chip footprint only
    itemsize = jnp.dtype(logits.dtype).itemsize
    # double-buffered input tile + ~3 f32-sized elementwise temporaries
    bytes_per_row = c_vmem * (2 * itemsize + 3 * 4)
    tm = budget // bytes_per_row
    tm = min(tm, 4096, _round_up(N, 16))
    tm = (tm // 16) * 16 if tm >= 16 else 8

    num_blocks = -(-N // tm)
    n_super = 1 if (_is_single_tensorcore() or num_blocks < 2) else 2
    inner = -(-num_blocks // n_super)
    last_block = num_blocks - 1

    def in_map(si, ki):
        # Clamp so redundant trailing grid steps re-read the last real block;
        # their contribution is masked in-kernel via the row bound check.
        return (jnp.minimum(si * inner + ki, last_block), 0)

    kernel = functools.partial(_ce_kernel, n_rows=N, inner=inner, tm=tm)

    sum_out, cnt_out = pl.pallas_call(
        kernel,
        out_shape=(
            jax.ShapeDtypeStruct((n_super * 8, 128), jnp.float32),
            jax.ShapeDtypeStruct((n_super * 8, 128), jnp.int32),
        ),
        grid_spec=pltpu.PrefetchScalarGridSpec(
            num_scalar_prefetch=0,
            grid=(n_super, inner),
            in_specs=[
                pl.BlockSpec((tm, C), in_map),   # true-C last dim: no lane padding traffic
                pl.BlockSpec((tm, 1), in_map),
            ],
            out_specs=(
                pl.BlockSpec((8, 128), lambda si, ki: (si, 0)),
                pl.BlockSpec((8, 128), lambda si, ki: (si, 0)),
            ),
        ),
        compiler_params=pltpu.CompilerParams(
            # TODO(synk): verify via xprof that "parallel" shards the superblock
            # axis across both v7x TensorCores; fall back to pltpu.CORE_PARALLEL
            # / core_map if it runs serially.
            dimension_semantics=("parallel", "arbitrary"),
            vmem_limit_bytes=int(vmem_limit),
        ),
    )(logits, tgt2)

    total = jnp.sum(sum_out.reshape(n_super, 8, 128)[:, 0, 0])
    count = jnp.sum(cnt_out.reshape(n_super, 8, 128)[:, 0, 0]).astype(jnp.float32)
    return total / count


def _reference(pred, target):
    C = pred.shape[-1]
    logits = pred.reshape(-1, C).astype(jnp.float32)
    tgt = target.reshape(-1).astype(jnp.int32)
    logp = jax.nn.log_softmax(logits, axis=-1)
    nll = -jnp.take_along_axis(logp, tgt[:, None], axis=-1)[:, 0]
    return jnp.mean(nll)


if __name__ == "__main__":
    key = jax.random.PRNGKey(0)

    # case 1: the shapes implied by the module (batch, seq, num_classes)
    k1, k2, k3, k4 = jax.random.split(key, 4)
    batch, seq, num_classes = 2, 8, 32
    pred = jax.random.normal(k1, (batch, seq, num_classes), dtype=jnp.float32)
    target = jax.random.randint(k2, (batch, seq), 0, num_classes, dtype=jnp.int32)
    loss = jax.block_until_ready(cross_entropy(pred, target))
    ref = jax.block_until_ready(_reference(pred, target))
    assert jnp.allclose(loss, ref, rtol=1e-5, atol=1e-5), (loss, ref)

    # case 2: non-aligned rows and classes (exercises edge-block masking, true-C block)
    pred2 = jax.random.normal(k3, (3, 7, 33), dtype=jnp.float32)
    target2 = jax.random.randint(k4, (3, 7), 0, 33, dtype=jnp.int32)
    loss2 = jax.block_until_ready(cross_entropy(pred2, target2))
    ref2 = jax.block_until_ready(_reference(pred2, target2))
    assert jnp.allclose(loss2, ref2, rtol=1e-5, atol=1e-5), (loss2, ref2)

    print("KERNEL_OK")
</pallas_src>

<mosaic_0001>
module attributes {stable_mosaic.version = 11 : i64} {
  func.func @_ce_kernel(%arg0: i32, %arg1: i32, %arg2: memref<16x32xf32, #tpu.memory_space<vmem>>, %arg3: memref<16x1xi32, #tpu.memory_space<vmem>>, %arg4: memref<8x128xf32, #tpu.memory_space<vmem>>, %arg5: memref<8x128xi32, #tpu.memory_space<vmem>>) attributes {dimension_semantics = [#tpu.dimension_semantics<parallel>, #tpu.dimension_semantics<arbitrary>], iteration_bounds = array<i64: 1, 1>, scalar_prefetch = 0 : i64, scratch_operands = 0 : i64, tpu.core_type = #tpu.core_type<tc>, window_params = [{transform_indices = @transform_0, window_bounds = array<i64: 16, 32>}, {transform_indices = @transform_1, window_bounds = array<i64: 16, 1>}, {transform_indices = @transform_2, window_bounds = array<i64: 8, 128>}, {transform_indices = @transform_3, window_bounds = array<i64: 8, 128>}]} {
    %c0_i32 = arith.constant 0 : i32
    %0 = arith.cmpi eq, %arg1, %c0_i32 : i32
    %1 = arith.extui %0 : i1 to i32
    %c0_i32_0 = arith.constant 0 : i32
    %2 = arith.cmpi ne, %1, %c0_i32_0 : i32
    scf.if %2 {
      %cst_19 = arith.constant 0.000000e+00 : f32
      %51 = vector.broadcast %cst_19 : f32 to vector<8x128xf32>
      %c0_20 = arith.constant 0 : index
      %c0_21 = arith.constant 0 : index
      %52 = vector.load %arg4[%c0_20, %c0_21] : memref<8x128xf32, #tpu.memory_space<vmem>>, vector<8x128xf32>
      tpu.vector_store %arg4[%c0_20, %c0_21], %51 {strides = array<i32>} : memref<8x128xf32, #tpu.memory_space<vmem>>, vector<8x128xf32>,
      %c0_i32_22 = arith.constant 0 : i32
      %53 = vector.broadcast %c0_i32_22 : i32 to vector<8x128xi32>
      %c0_23 = arith.constant 0 : index
      %c0_24 = arith.constant 0 : index
      %54 = vector.load %arg5[%c0_23, %c0_24] : memref<8x128xi32, #tpu.memory_space<vmem>>, vector<8x128xi32>
      tpu.vector_store %arg5[%c0_23, %c0_24], %53 {strides = array<i32>} : memref<8x128xi32, #tpu.memory_space<vmem>>, vector<8x128xi32>,
    } else {
    }
    %c0 = arith.constant 0 : index
    %c0_1 = arith.constant 0 : index
    %3 = vector.load %arg2[%c0, %c0_1] : memref<16x32xf32, #tpu.memory_space<vmem>>, vector<16x32xf32>
    %c0_2 = arith.constant 0 : index
    %c0_3 = arith.constant 0 : index
    %4 = vector.load %arg3[%c0_2, %c0_3] : memref<16x1xi32, #tpu.memory_space<vmem>>, vector<16x1xi32>
    %c1_i32 = arith.constant 1 : i32
    %5 = arith.muli %arg0, %c1_i32 : i32
    %6 = arith.addi %5, %arg1 : i32
    %c16_i32 = arith.constant 16 : i32
    %7 = arith.muli %6, %c16_i32 : i32
    %8 = tpu.iota {dimensions = array<i32: 0>} : vector<16x1xi32>
    %9 = vector.broadcast %7 : i32 to vector<16x1xi32>
    %10 = arith.addi %9, %8 : vector<16x1xi32>
    %c-100_i32 = arith.constant -100 : i32
    %11 = vector.broadcast %c-100_i32 : i32 to vector<16x1xi32>
    %12 = arith.cmpi ne, %4, %11 : vector<16x1xi32>
    %c16_i32_4 = arith.constant 16 : i32
    %13 = vector.broadcast %c16_i32_4 : i32 to vector<16x1xi32>
    %14 = arith.cmpi slt, %10, %13 : vector<16x1xi32>
    %15 = arith.andi %12, %14 : vector<16x1xi1>
    %cst = arith.constant dense<0xFF800000> : vector<16xf32>
    %16 = vector.multi_reduction <maximumf>, %3, %cst [1] : vector<16x32xf32> to vector<16xf32>
    %17 = vector.shape_cast %16 : vector<16xf32> to vector<16x1xf32>
    %18 = vector.broadcast %17 : vector<16x1xf32> to vector<16x32xf32>
    %19 = arith.subf %3, %18 : vector<16x32xf32>
    %20 = math.exp %19 : vector<16x32xf32>
    %cst_5 = arith.constant dense<0.000000e+00> : vector<16xf32>
    %21 = vector.multi_reduction <add>, %20, %cst_5 [1] : vector<16x32xf32> to vector<16xf32>
    %22 = vector.shape_cast %21 : vector<16xf32> to vector<16x1xf32>
    %23 = tpu.iota {dimensions = array<i32: 1>} : vector<16x32xi32>
    %24 = vector.broadcast %4 : vector<16x1xi32> to vector<16x32xi32>
    %25 = arith.cmpi eq, %23, %24 : vector<16x32xi32>
    %cst_6 = arith.constant 0.000000e+00 : f32
    %26 = vector.broadcast %cst_6 : f32 to vector<16x32xf32>
    %27 = arith.select %25, %19, %26 : vector<16x32xi1>, vector<16x32xf32>
    %cst_7 = arith.constant dense<0.000000e+00> : vector<16xf32>
    %28 = vector.multi_reduction <add>, %27, %cst_7 [1] : vector<16x32xf32> to vector<16xf32>
    %29 = vector.shape_cast %28 : vector<16xf32> to vector<16x1xf32>
    %30 = math.log %22 : vector<16x1xf32>
    %31 = arith.subf %30, %29 : vector<16x1xf32>
    %cst_8 = arith.constant 0.000000e+00 : f32
    %32 = vector.broadcast %cst_8 : f32 to vector<16x1xf32>
    %33 = arith.select %15, %31, %32 : vector<16x1xi1>, vector<16x1xf32>
    %c0_9 = arith.constant 0 : index
    %c0_10 = arith.constant 0 : index
    %34 = vector.load %arg4[%c0_9, %c0_10] : memref<8x128xf32, #tpu.memory_space<vmem>>, vector<8x128xf32>
    %35 = vector.shape_cast %33 : vector<16x1xf32> to vector<1x16x1xf32>
    %cst_11 = arith.constant dense<0.000000e+00> : vector<1xf32>
    %36 = vector.multi_reduction <add>, %35, %cst_11 [1, 2] : vector<1x16x1xf32> to vector<1xf32>
    %37 = vector.shape_cast %36 : vector<1xf32> to vector<1x1x1xf32>
    %38 = vector.extract %37[0, 0, 0] : f32 from vector<1x1x1xf32>
    %39 = vector.broadcast %38 : f32 to vector<8x128xf32>
    %40 = arith.addf %34, %39 : vector<8x128xf32>
    %c0_12 = arith.constant 0 : index
    %c0_13 = arith.constant 0 : index
    %41 = vector.load %arg4[%c0_12, %c0_13] : memref<8x128xf32, #tpu.memory_space<vmem>>, vector<8x128xf32>
    tpu.vector_store %arg4[%c0_12, %c0_13], %40 {strides = array<i32>} : memref<8x128xf32, #tpu.memory_space<vmem>>, vector<8x128xf32>,
    %c0_14 = arith.constant 0 : index
    %c0_15 = arith.constant 0 : index
    %42 = vector.load %arg5[%c0_14, %c0_15] : memref<8x128xi32, #tpu.memory_space<vmem>>, vector<8x128xi32>
    %43 = arith.extui %15 : vector<16x1xi1> to vector<16x1xi32>
    %44 = vector.shape_cast %43 : vector<16x1xi32> to vector<1x16x1xi32>
    %cst_16 = arith.constant dense<0> : vector<1xi32>
    %45 = vector.multi_reduction <add>, %44, %cst_16 [1, 2] : vector<1x16x1xi32> to vector<1xi32>
    %46 = vector.shape_cast %45 : vector<1xi32> to vector<1x1x1xi32>
    %47 = vector.extract %46[0, 0, 0] : i32 from vector<1x1x1xi32>
    %48 = vector.broadcast %47 : i32 to vector<8x128xi32>
    %49 = arith.addi %42, %48 : vector<8x128xi32>
    %c0_17 = arith.constant 0 : index
    %c0_18 = arith.constant 0 : index
    %50 = vector.load %arg5[%c0_17, %c0_18] : memref<8x128xi32, #tpu.memory_space<vmem>>, vector<8x128xi32>
    tpu.vector_store %arg5[%c0_17, %c0_18], %49 {strides = array<i32>} : memref<8x128xi32, #tpu.memory_space<vmem>>, vector<8x128xi32>,
    return
  }
  func.func @transform_0(%arg0: i32, %arg1: i32) -> (i32, i32) {
    %c1_i32 = arith.constant 1 : i32
    %0 = arith.muli %arg0, %c1_i32 : i32
    %1 = arith.addi %0, %arg1 : i32
    %c0_i32 = arith.constant 0 : i32
    %2 = arith.minsi %1, %c0_i32 : i32
    %c0_i32_0 = arith.constant 0 : i32
    %c0_i32_1 = arith.constant 0 : i32
    return %2, %c0_i32_0 : i32, i32
  }
  func.func @transform_1(%arg0: i32, %arg1: i32) -> (i32, i32) {
    %c1_i32 = arith.constant 1 : i32
    %0 = arith.muli %arg0, %c1_i32 : i32
    %1 = arith.addi %0, %arg1 : i32
    %c0_i32 = arith.constant 0 : i32
    %2 = arith.minsi %1, %c0_i32 : i32
    %c0_i32_0 = arith.constant 0 : i32
    %c0_i32_1 = arith.constant 0 : i32
    return %2, %c0_i32_0 : i32, i32
  }
  func.func @transform_2(%arg0: i32, %arg1: i32) -> (i32, i32) {
    %c0_i32 = arith.constant 0 : i32
    %c0_i32_0 = arith.constant 0 : i32
    return %arg0, %c0_i32 : i32, i32
  }
  func.func @transform_3(%arg0: i32, %arg1: i32) -> (i32, i32) {
    %c0_i32 = arith.constant 0 : i32
    %c0_i32_0 = arith.constant 0 : i32
    return %arg0, %c0_i32 : i32, i32
  }
}

</mosaic_0001>

<bundles_post_ra>
// kernel: tpu_custom_call.1
= control target key start
LH: loop header
LB: loop body
LE: loop exit
PB: predicated region body
PF: predicated region fallthrough
CT: control target
= control target key end

     0   :  { %9 = vsyncpa [#allocation3], 0  ;;  %vm103_vm0 = vcmask 261120   ;;  %v299_v4 = vmov 0   ;;  %s378_s0 = inlined_call_operand.vmem [shape: f32[16,32], index: 0, kind: input, shape index: {}]   ;;  %s379_s1 = inlined_call_operand.vmem [shape: s32[16,1], index: 1, kind: input, shape index: {}]   ;;  %s380_s2 = inlined_call_operand.hbm [shape: f32[8,128], index: 2, kind: output, shape index: {0}]   ;;  %s381_s3 = inlined_call_operand.hbm [shape: s32[8,128], index: 3, kind: output, shape index: {1}]  }
   0x1   :  { %v85_v0 = vld [vmem:[%s378_s0] sm:$0xff]  ;;  %v86_v1 = vld [vmem:[%s378_s0 + $0x8] sm:$0xff]  ;;  %241 = vset.pattern.permute.xlu1 %v299_v4  ;;  %242 = vset.pattern.permute.xlu0 %v299_v4 }
   0x2   :  { %v331_v2 = vld [vmem:[%s379_s1] sm:$0xff]  ;;  %v104_v3 = vsel %vm103_vm0, %v85_v0, -inf }
   0x3   :  { %10 = vsyncpa [#allocation5], 0  ;;  %105 = vmax.xlane.f32.xlu0 %v104_v3  ;;  %125 = vperm.xlu1 %241, %v331_v2   ;;  %v107_v5 = vsel %vm103_vm0, %v86_v1, -inf  ;;  %v88_v6 = vld [vmem:[%s379_s1 + $0x8] sm:$0xff]  ;;  %v122_v12 = vlaneseq  ;;  %vm97_vm3 = vcmp.ne.s32.totalorder %v331_v2, 4294967196  ;;  %vm149_vm5 = vcmask 7168  }
   0x4   :  { %vm98_vm4 = vcmp.ne.s32.totalorder %v88_v6, 4294967196  ;;  %v166_v25 = vsel %vm97_vm3, 1, %v299_v4  ;;  %s300_s0 = smov [#allocation2]   ;;  %s301_s21 = smov [#allocation4]  }
   0x5   :  { %v123_v15 = vand.u32 127, %v122_v12  ;;  %v167_v26 = vsel %vm98_vm4, 1, %v299_v4  ;;  %v168_v27 = vsel %vm149_vm5, %v166_v25, 0  ;;  %s199_s1 = sshll.u32 %s300_s0, 4  ;;  %s209_s22 = sshll.u32 %s301_s21, 4  ;;  %s200_s1 = int_to_ptr.vmem [resolvable:$true] %s199_s1  ;;  %s210_s22 = int_to_ptr.vmem [resolvable:$true] %s209_s22 }
   0x6   :  { %v169_v28 = vsel %vm149_vm5, %v167_v26, 0  ;;  %s251_s24 = scalar_lea.vmem %s200_s1, 128  ;;  %p256_p1 = scmp.lt.s32.totalorder %s200_s1, %s200_s1 }
   0x7   :  { %108 = vmax.xlane.f32.xlu0 %v107_v5  ;;  %128 = vperm.xlu1 %241, %v88_v6   ;;  %v170_v29 = vadd.s32 %v169_v28, %v168_v27  ;;  %p252_p0 = scmp.ne.s32.totalorder %s200_s1, %s251_s24  ;;  %p257_p2 = scmp.lt.s32.totalorder %s251_s24, %s251_s24 }
   0x9   :  { %v172_v30 = vshrl.u32 %v170_v29, 16  ;;  %v171_v32 = vand.u32 65535, %v170_v29  ;;  %p258_p3 = por %p257_p2, %p256_p1 }
   0xb   :  { %v174_v31 = vcvt.s32.f32 %v172_v30  ;;  %v173_v33 = vcvt.s32.f32 %v171_v32  ;;  %p259_p4 = pnand %p258_p3, %p252_p0 }
  0x82   :  { %v126_v14 = vpop.permute.xlu1 %125 }
  0x83   :  { %vm130_vm1 = vcmp.eq.s32.totalorder %v123_v15, %v126_v14 }
  0x86   :  { %v129_v17 = vpop.permute.xlu1 %128 }
  0x87   :  { %vm131_vm2 = vcmp.eq.s32.totalorder %v123_v15, %v129_v17 }
  0x90   :  { %v106_v7 = vpop.xlane.xlu0 %105 }
  0x91   :  { %v110_v8 = vsub.f32 %v85_v0, %v106_v7 }
  0x93   :  { %v112_v9 = vmul.f32 1.442695, %v110_v8  ;;  %v132_v19 = vsel %vm130_vm1, %v110_v8, 0.0 }
  0x94   :  { %v109_v10 = vpop.xlane.xlu0 %108  ;;  %v134_v22 = vsel %vm103_vm0, %v132_v19, 0.0 }
  0x95   :  { %243 = vpow2.f32 %v112_v9  ;;  %v111_v11 = vsub.f32 %v86_v1, %v109_v10 }
  0x97   :  { %v114_v13 = vmul.f32 1.442695, %v111_v11  ;;  %v133_v23 = vsel %vm131_vm2, %v111_v11, 0.0 }
  0x98   :  { %v137_v24 = vsel %vm103_vm0, %v133_v23, 0.0 }
  0x99   :  { %245 = vpow2.f32 %v114_v13 }
  0x9f   :  { %v244_v16 = vpop.eup %243 }
  0xa0   :  { %v116_v18 = vsel %vm103_vm0, %v244_v16, 0.0 }
  0xa1   :  { %117 = vadd.xlane.f32.xlu0 %v116_v18 }
  0xa3   :  { %v246_v20 = vpop.eup %245 }
  0xa4   :  { %v119_v21 = vsel %vm103_vm0, %v246_v20, 0.0 }
  0xa5   :  { %120 = vadd.xlane.f32.xlu1 %v119_v21  ;;  %135 = vadd.xlane.f32.xlu0 %v134_v22 }
  0xa9   :  { %138 = vadd.xlane.f32.xlu0 %v137_v24 }
  0xad   :  { %177 = vadd.xlane.f32.xlu0 %v174_v31 }
  0xb1   :  { %175 = vadd.xlane.f32.xlu0 %v173_v33 }
 0x12e   :  { %v118_v34 = vpop.xlane.xlu0 %117 }
 0x12f   :  { %247 = vlog2.f32 %v118_v34 }
 0x132   :  { %v121_v35 = vpop.xlane.xlu1 %120  ;;  %v136_v37 = vpop.xlane.xlu0 %135 }
 0x133   :  { %249 = vlog2.f32 %v121_v35 }
 0x136   :  { %v139_v42 = vpop.xlane.xlu0 %138 }
 0x139   :  { %v248_v36 = vpop.eup %247 }
 0x13a   :  { %v141_v38 = vmul.f32 0.6931472, %v248_v36  ;;  %v178_v49 = vpop.xlane.xlu0 %177 }
 0x13b   :  { %v180_v50 = vcvt.f32.s32 %v178_v49 }
 0x13c   :  { %v144_v39 = vsub.f32 %v141_v38, %v136_v37 }
 0x13d   :  { %v250_v40 = vpop.eup %249  ;;  %v181_v52 = vshll.u32 %v180_v50, 16 }
 0x13e   :  { %v143_v41 = vmul.f32 0.6931472, %v250_v40  ;;  %v146_v43 = vsel %vm97_vm3, %v144_v39, 0.0  ;;  %v176_v51 = vpop.xlane.xlu0 %175 }
 0x13f   :  { %v150_v46 = vsel %vm149_vm5, %v146_v43, 0.0  ;;  %v179_v53 = vcvt.f32.s32 %v176_v51 }
 0x140   :  { %v145_v44 = vsub.f32 %v143_v41, %v139_v42 }
 0x141   :  { %v182_v54 = vadd.s32 %v181_v52, %v179_v53 }
 0x142   :  { %v147_v45 = vsel %vm98_vm4, %v145_v44, 0.0 }
 0x143   :  { %v151_v47 = vsel %vm149_vm5, %v147_v45, 0.0  ;;  %v183_v55 = vrot.slane %v182_v54, 4 }
 0x144   :  { %v152_v48 = vadd.f32 %v151_v47, %v150_v46 }
 0x145   :  { %v184_v56 = vadd.s32 %v183_v55, %v182_v54 }
 0x146   :  { %153 = vadd.xlane.f32.xlu0 %v152_v48 }
 0x147   :  { %v185_v58 = vrot.slane %v184_v56, 2 }
 0x149   :  { %v186_v61 = vadd.s32 %v185_v58, %v184_v56 }
 0x14b   :  { %v187_v0 = vrot.slane %v186_v61, 1 }
 0x14d   :  { %v188_v3 = vadd.s32 %v187_v0, %v186_v61 }
 0x1d3   :  { %v154_v57 = vpop.xlane.xlu0 %153 }
 0x1d4   :  { %v155_v59 = vrot.slane %v154_v57, 4 }
 0x1d6   :  { %v156_v60 = vadd.f32 %v155_v59, %v154_v57 }
 0x1d8   :  { %v157_v62 = vrot.slane %v156_v60, 2 }
 0x1da   :  { %v158_v63 = vadd.f32 %v157_v62, %v156_v60 }
 0x1dc   :  { %v159_v1 = vrot.slane %v158_v63, 1 }
 0x1de   :  { %v160_v2 = vadd.f32 %v159_v1, %v158_v63 }
 0x1e0   :  { %233 = vpush %v160_v2 }
 0x1e1   :  { %235 = vpush %v188_v3 }
 0x211   :  { %s234_s20 = spop %233 }
 0x212   :  { %v162_v4 = vstv %s234_s20  ;;  %s236_s23 = spop %235 }
 0x213   :  { %v190_v5 = vstv %s236_s23  ;;  %164 = vst [vmem:[#allocation2] sm:$0xff] %v162_v4 }
 0x214   :  { %192 = vst [vmem:[#allocation4] sm:$0xff] %v190_v5 }
 0x215   :  { %262 = shalt.err (!%p259_p4)
}
 0x216   :  { %s263_s27 = scalar_lea.hbm %s380_s2, 128 }
 0x217   :  { %p264_p5 = scmp.ne.s32.totalorder %s380_s2, %s263_s27  ;;  %p267_p6 = scmp.lt.u32.totalorder %s263_s27, %s380_s2 }
 0x219   :  { %p269_p7 = pnand %p267_p6, %p264_p5 }
 0x21b   :  { %272 = shalt.err (!%p269_p7)
}
 0x21c   :  { %202 = dma.vmem_to_hbm [thread:$0]  %s200_s1, 128, %s380_s2, [#allocation3]  }
 0x21d   :  { %s273_s7 = scalar_lea.vmem %s210_s22, 128  ;;  %p278_p9 = scmp.lt.s32.totalorder %s210_s22, %s210_s22 }
 0x21e   :  { %p274_p8 = scmp.ne.s32.totalorder %s210_s22, %s273_s7  ;;  %p279_p10 = scmp.lt.s32.totalorder %s273_s7, %s273_s7 }
 0x220   :  { %p280_p11 = por %p279_p10, %p278_p9 }
 0x222   :  { %p281_p12 = pnand %p280_p11, %p274_p8 }
 0x224   :  { %284 = shalt.err (!%p281_p12)
}
 0x225   :  { %s285_s10 = scalar_lea.hbm %s381_s3, 128 }
 0x226   :  { %p286_p13 = scmp.ne.s32.totalorder %s381_s3, %s285_s10  ;;  %p289_p0 = scmp.lt.u32.totalorder %s285_s10, %s381_s3 }
 0x228   :  { %p291_p1 = pnand %p289_p0, %p286_p13 }
 0x22a   :  { %294 = shalt.err (!%p291_p1)
}
 0x22b   :  { %212 = dma.vmem_to_hbm [thread:$0]  %s210_s22, 128, %s381_s3, [#allocation5]  }
 0x22c   :  { %295 = dma.done.wait [#allocation3], 128  }
 0x22d   :  { %296 = vsyncadd [#allocation3], 4294967168 }
 0x22e   :  { %297 = dma.done.wait [#allocation5], 128  }
 0x22f   :  { %298 = vsyncadd [#allocation5], 4294967168 }
 0x230   :  { %219 = vsyncpa [#allocation3], 1 }
 0x231   :  { %220 = vsyncpa [#allocation5], 1 }

</bundles_post_ra>
